<compile_context>
chip_gen: v7x
topology: tpu7x:2x2x1
jax: 0.10.0
libtpu: 0.0.40
codegen_flags: <defaults>
</compile_context>

<pallas_src>
import jax
import jax.numpy as jnp
from jax.experimental import pallas as pl
from jax.experimental.pallas import tpu as pltpu


def _same_pad_lr(k):
    """Left/right padding used by conv1d_same_padding (the extra zero goes on
    the right for even kernel sizes — the F.pad(input, [0, 1]) branch)."""
    total = k - 1
    left = total // 2
    return left, total - left


def _round_up(x, m):
    return ((x + m - 1) // m) * m


# ------------------------------ fused kernel ---------------------------------
def _make_fused_kernel(seq_len, tile_len, ks, cins, cb,
                       use_bottleneck, residual, merge_1x1,
                       im2col_flags, compute_dtype):
    k1, k2, k3 = ks
    p1l, _ = _same_pad_lr(k1)
    p2l, _ = _same_pad_lr(k2)
    p3l, _ = _same_pad_lr(k3)
    left_halo = p1l + p2l + p3l                 # left halo of the conv chain
    win_c1 = tile_len + (k2 - 1) + (k3 - 1)     # rows after conv1
    win_c2 = tile_len + (k3 - 1)                # rows after conv2

    def conv_valid(x_win, w_flat, k, cin, out_len, use_im2col):
        xc = x_win.astype(compute_dtype)        # bf16 MXU operand by default
        if k == 1:
            return jnp.dot(xc, w_flat, preferred_element_type=jnp.float32)
        if use_im2col:
            # 'valid' conv as ONE MXU matmul: (out_len, K*Cin) @ (K*Cin, Cout).
            cols = jnp.concatenate(
                [xc[i:i + out_len, :] for i in range(k)], axis=1)
            return jnp.dot(cols, w_flat, preferred_element_type=jnp.float32)
        # k-tap accumulation: no k-fold lane-concat for large kernels (the MXU
        # has slack at these channel widths; the relayout/VMEM churn does not).
        acc = jnp.dot(xc[0:out_len, :], w_flat[0:cin, :],
                      preferred_element_type=jnp.float32)
        for i in range(1, k):
            acc = acc + jnp.dot(xc[i:i + out_len, :],
                                w_flat[i * cin:(i + 1) * cin, :],
                                preferred_element_type=jnp.float32)
        return acc

    def kernel(*refs):
        it = iter(refs)
        x_ref = next(it)                                  # (1,1,win_in,Cin)
        wbr_ref = next(it) if merge_1x1 else None         # (Cin, Cb+Cout)
        wb_ref = next(it) if (use_bottleneck and not merge_1x1) else None
        w1_ref = next(it)                                 # (k1*C0, Cout)
        w2_ref = next(it)                                 # (k2*Cout, Cout)
        w3_ref = next(it)                                 # (k3*Cout, Cout) BN scale folded
        b3_ref = next(it)                                 # (1, Cout) f32 (BN bias)
        wr_ref = next(it) if (residual and not merge_1x1) else None
        br_ref = next(it) if residual else None           # (1, Cout) f32
        o_ref = next(it)                                  # (1, Cout, tile_len)

        start = pl.program_id(1) * tile_len
        xc = x_ref[0, 0].astype(compute_dtype)            # (win_in, Cin)

        r = None
        if merge_1x1:
            # Bottleneck + residual 1x1 convs fused into one MXU matmul.
            z = jnp.dot(xc, wbr_ref[...], preferred_element_type=jnp.float32)
            h = z[:, :cb]
            r = z[left_halo:left_halo + tile_len, cb:]
        elif use_bottleneck:
            h = jnp.dot(xc, wb_ref[...], preferred_element_type=jnp.float32)
        else:
            h = xc

        c1 = conv_valid(h, w1_ref[...], k1, cins[0], win_c1, im2col_flags[0])
        # Rows whose global sequence index falls outside [0, seq_len) are
        # exactly the zeros the next conv's 'same' padding would have seen.
        # One (rows, 1) iota, reused (shifted) for both masks, lane-broadcast.
        g1 = (jax.lax.broadcasted_iota(jnp.int32, (win_c1, 1), 0)
              + (start - p2l - p3l))
        c1 = jnp.where(jnp.logical_and(g1 >= 0, g1 < seq_len), c1, 0.0)

        c2 = conv_valid(c1, w2_ref[...], k2, cins[1], win_c2, im2col_flags[1])
        g2 = g1[:win_c2] + p2l
        c2 = jnp.where(jnp.logical_and(g2 >= 0, g2 < seq_len), c2, 0.0)

        c3 = conv_valid(c2, w3_ref[...], k3, cins[2], tile_len, im2col_flags[2])
        out = jnp.maximum(c3 + b3_ref[...], 0.0)          # folded-BN bias + ReLU

        if residual:
            if r is None:
                r = jnp.dot(xc[left_halo:left_halo + tile_len, :], wr_ref[...],
                            preferred_element_type=jnp.float32)
            out = out + jnp.maximum(r + br_ref[...], 0.0)

        # Dropout(p=0.4) is identity in eval mode.
        # Cast first, then transpose: lane-dense store along L, fewer XLU bytes.
        o_ref[0] = out.astype(o_ref.dtype).T

    return kernel


# ------------------------------- forward --------------------------------------
def inception_block_forward(x_ncl, params, residual, use_bottleneck,
                            l_tile=2048, compute_dtype=jnp.bfloat16,
                            vmem_limit_bytes=None):
    """x_ncl: (N, C_in, L) PyTorch Conv1d layout. Returns (N, C_out, L).

    compute_dtype: dtype fed to the MXU matmuls (bf16 by default; pass
    jnp.float32 for bit-accurate-to-f32 results).
    """
    batch, c_in, seq_len = x_ncl.shape
    conv_ws = params["conv_ws"]
    ks = tuple(int(w.shape[0]) for w in conv_ws)
    c_out = int(conv_ws[-1].shape[-1])
    cb = int(params["bottleneck_w"].shape[-1]) if use_bottleneck else 0
    c0 = cb if use_bottleneck else c_in
    cins = (c0, c_out, c_out)
    merge_1x1 = use_bottleneck and residual

    # Fold the eval-mode BatchNorm affine into the last / residual conv weights
    # in f32, then cast matmul weights to the MXU compute dtype.
    f32 = jnp.float32
    w1 = conv_ws[0].astype(f32).reshape(-1, conv_ws[0].shape[-1])
    w2 = conv_ws[1].astype(f32).reshape(-1, conv_ws[1].shape[-1])
    w3 = (conv_ws[2].astype(f32)
          * params["bn_scale"].astype(f32)[None, None, :]).reshape(-1, c_out)
    b3 = params["bn_bias"].astype(f32).reshape(1, c_out)
    w1c, w2c, w3c = (w.astype(compute_dtype) for w in (w1, w2, w3))

    if use_bottleneck:
        wb = params["bottleneck_w"].astype(f32).reshape(c_in, cb)
    if residual:
        wr = (params["res_w"].astype(f32)
              * params["bn_r_scale"].astype(f32)[None, None, :]
              ).reshape(c_in, c_out)
        br = params["bn_r_bias"].astype(f32).reshape(1, c_out)

    weight_inputs = []
    if merge_1x1:
        weight_inputs.append(
            jnp.concatenate([wb, wr], axis=-1).astype(compute_dtype))
    elif use_bottleneck:
        weight_inputs.append(wb.astype(compute_dtype))
    weight_inputs += [w1c, w2c, w3c, b3]
    if residual and not merge_1x1:
        weight_inputs.append(wr.astype(compute_dtype))
    if residual:
        weight_inputs.append(br)

    # im2col only when the k-fold lane-concat stays small; otherwise k-tap.
    im2col_flags = tuple(k == 1 or k * cin <= 256 for k, cin in zip(ks, cins))

    # Always set vmem_limit_bytes (v7x: 64 MiB physical / 32 MiB scoped default;
    # v5e scoped default is only 16 MiB of 128 MiB physical).
    if vmem_limit_bytes is None:
        try:
            cap = int(pltpu.get_tpu_info().vmem_capacity_bytes)
        except Exception:
            cap = 64 * 1024 * 1024
        vmem_limit_bytes = min(int(0.75 * cap), 100 * 1024 * 1024)
    vmem_limit_bytes = int(vmem_limit_bytes)

    # Sequence tiling: the conv-chain halo is recomputed per tile in-kernel.
    left_halo = sum(_same_pad_lr(k)[0] for k in ks)
    halo = sum(k - 1 for k in ks)
    in_itemsize = jnp.dtype(x_ncl.dtype).itemsize
    cdt_itemsize = jnp.dtype(compute_dtype).itemsize
    weight_bytes = sum(int(a.size) * a.dtype.itemsize for a in weight_inputs)
    c_mid = max(c0, c_out, (cb + c_out) if merge_1x1 else 0)

    def _est_vmem(tl):
        win = tl + halo
        est = 2 * win * c_in * in_itemsize            # input window (x2 buffered)
        est += 2 * c_out * tl * in_itemsize           # output tile  (x2 buffered)
        est += 2 * weight_bytes                       # weights      (x2 buffered)
        est += 4 * win * c_mid * 4                    # f32 intermediates
        for k, cin, flag in zip(ks, cins, im2col_flags):
            if flag and k > 1:
                est += win * k * cin * cdt_itemsize   # im2col cols buffer
        return est

    if seq_len <= max(l_tile, 128):
        tile_len = seq_len
    else:
        tile_len = max(128, (min(l_tile, seq_len) // 128) * 128)
    if batch == 1 and tile_len >= seq_len and seq_len >= 256:
        # v7x has 2 TensorCores per chip: never leave a (1, 1) grid.
        tile_len = _round_up(pl.cdiv(seq_len, 2), 128)
    budget = int(0.6 * vmem_limit_bytes)
    while tile_len > 128 and _est_vmem(tile_len) > budget:
        tile_len = max(128, ((tile_len // 2) // 128) * 128)
    n_tiles = pl.cdiv(seq_len, tile_len)
    win_in = tile_len + halo

    # Overlapping halo windows (N, n_tiles, win_in, Cin): per-step DMA is just
    # the window, so VMEM use is independent of L. Original dtype is kept —
    # the cast to compute_dtype happens in-kernel.
    x_lc = jnp.transpose(x_ncl, (0, 2, 1))                       # (N, L, Cin)
    lpad = n_tiles * tile_len + halo
    x_padded = jnp.pad(
        x_lc, ((0, 0), (left_halo, lpad - left_halo - seq_len), (0, 0)))
    row_idx = (jnp.arange(n_tiles)[:, None] * tile_len
               + jnp.arange(win_in)[None, :])                    # (n_tiles, win_in)
    x_win = jnp.take(x_padded, row_idx, axis=1)                  # (N, nt, win, Cin)
    # TODO(synk): keep the surrounding model channels-last to drop the
    # remaining input-side transpose entirely.

    kernel = _make_fused_kernel(seq_len, tile_len, ks, cins, cb,
                                use_bottleneck, residual, merge_1x1,
                                im2col_flags, compute_dtype)

    def _full(shape):
        return pl.BlockSpec(shape, lambda n, t: (0,) * len(shape))

    in_specs = ([pl.BlockSpec((1, 1, win_in, c_in), lambda n, t: (n, t, 0, 0))]
                + [_full(a.shape) for a in weight_inputs])

    return pl.pallas_call(
        kernel,
        out_shape=jax.ShapeDtypeStruct((batch, c_out, seq_len), x_ncl.dtype),
        grid=(batch, n_tiles),
        in_specs=in_specs,
        out_specs=pl.BlockSpec((1, c_out, tile_len), lambda n, t: (n, 0, t)),
        compiler_params=pltpu.CompilerParams(
            dimension_semantics=("parallel", "parallel"),
            vmem_limit_bytes=vmem_limit_bytes),
    )(x_win, *weight_inputs)


# ------------------------------ parameters ------------------------------------
def init_inception_params(key, in_channels, out_channels, residual,
                          bottleneck_channels=32, kernel_size=41):
    use_bottleneck = bottleneck_channels > 0
    kernel_size_s = [kernel_size // 2 ** i for i in range(3)]
    start_channels = bottleneck_channels if use_bottleneck else in_channels
    channels = [start_channels] + [out_channels] * 3

    keys = jax.random.split(key, 8)
    p = {}
    if use_bottleneck:
        # PyTorch weight layout (Cout, Cin, K) maps to kernel layout (K, Cin, Cout).
        p["bottleneck_w"] = 0.1 * jax.random.normal(
            keys[0], (1, in_channels, bottleneck_channels), jnp.float32)
    p["conv_ws"] = [
        0.1 * jax.random.normal(
            keys[1 + i], (kernel_size_s[i], channels[i], channels[i + 1]),
            jnp.float32)
        for i in range(3)
    ]
    # BatchNorm1d(out_channels) fresh-module state, eval mode.
    eps = 1e-5
    gamma = jnp.ones((out_channels,), jnp.float32)
    beta = jnp.zeros((out_channels,), jnp.float32)
    rmean = jnp.zeros((out_channels,), jnp.float32)
    rvar = jnp.ones((out_channels,), jnp.float32)
    p["bn_scale"] = gamma / jnp.sqrt(rvar + eps)
    p["bn_bias"] = beta - rmean * p["bn_scale"]
    if residual:
        p["res_w"] = 0.1 * jax.random.normal(
            keys[5], (1, in_channels, out_channels), jnp.float32)
        p["bn_r_scale"] = gamma / jnp.sqrt(rvar + eps)
        p["bn_r_bias"] = beta - rmean * p["bn_r_scale"]
    return p


# ------------------------- pure-JAX reference (check) -------------------------
def _reference_forward(x_ncl, params, residual, use_bottleneck):
    """Unfused pure-JAX f32 reference (eval semantics) used only for validation."""
    x = jnp.transpose(x_ncl, (0, 2, 1)).astype(jnp.float32)   # (N, L, C)
    seq_len = x.shape[1]

    def conv_same(a, w):
        k = w.shape[0]
        lpad, rpad = _same_pad_lr(k)
        ap = jnp.pad(a, ((0, 0), (lpad, rpad), (0, 0)))
        return sum(jnp.einsum("nlc,co->nlo", ap[:, i:i + seq_len, :], w[i])
                   for i in range(k))

    org = x
    h = conv_same(x, params["bottleneck_w"]) if use_bottleneck else x
    for w in params["conv_ws"]:
        h = conv_same(h, w)
    y = jnp.maximum(h * params["bn_scale"] + params["bn_bias"], 0.0)
    if residual:
        r = conv_same(org, params["res_w"])
        y = y + jnp.maximum(r * params["bn_r_scale"] + params["bn_r_bias"], 0.0)
    return jnp.transpose(y, (0, 2, 1))


if __name__ == "__main__":
    key = jax.random.PRNGKey(0)
    k_x, k_p = jax.random.split(key)

    # Small shapes consistent with the module's forward.
    batch, c_in, seq_len = 2, 4, 16
    c_out = 8
    bottleneck_channels = 8
    kernel_size = 9            # per-layer kernel sizes [9, 4, 2]
    residual = True

    x = jax.random.normal(k_x, (batch, c_in, seq_len), jnp.float32)
    params = init_inception_params(
        k_p, c_in, c_out, residual,
        bottleneck_channels=bottleneck_channels, kernel_size=kernel_size)

    out = inception_block_forward(
        x, params, residual=residual,
        use_bottleneck=bottleneck_channels > 0)
    jax.block_until_ready(out)
    assert out.shape == (batch, c_out, seq_len), out.shape

    ref = _reference_forward(x, params, residual,
                             use_bottleneck=bottleneck_channels > 0)
    # bf16 MXU operands (default compute_dtype) vs f32 reference -> loose tol.
    assert jnp.allclose(out, ref, atol=3e-2, rtol=3e-2), \
        float(jnp.max(jnp.abs(out - ref)))
    print("KERNEL_OK")
</pallas_src>

<mosaic_0001>
module attributes {stable_mosaic.version = 11 : i64} {
  func.func @kernel(%arg0: i32, %arg1: i32, %arg2: memref<1x1x28x4xf32, #tpu.memory_space<vmem>>, %arg3: memref<4x16xbf16, #tpu.memory_space<vmem>>, %arg4: memref<72x8xbf16, #tpu.memory_space<vmem>>, %arg5: memref<32x8xbf16, #tpu.memory_space<vmem>>, %arg6: memref<16x8xbf16, #tpu.memory_space<vmem>>, %arg7: memref<1x8xf32, #tpu.memory_space<vmem>>, %arg8: memref<1x8xf32, #tpu.memory_space<vmem>>, %arg9: memref<1x8x16xf32, #tpu.memory_space<vmem>>) attributes {dimension_semantics = [#tpu.dimension_semantics<parallel>, #tpu.dimension_semantics<parallel>], iteration_bounds = array<i64: 2, 1>, scalar_prefetch = 0 : i64, scratch_operands = 0 : i64, tpu.core_type = #tpu.core_type<tc>, window_params = [{transform_indices = @transform_0, window_bounds = array<i64: 1, 1, 28, 4>}, {pipeline_mode = #tpu.pipeline_mode<synchronous>, transform_indices = @transform_1, window_bounds = array<i64: 4, 16>}, {pipeline_mode = #tpu.pipeline_mode<synchronous>, transform_indices = @transform_2, window_bounds = array<i64: 72, 8>}, {pipeline_mode = #tpu.pipeline_mode<synchronous>, transform_indices = @transform_3, window_bounds = array<i64: 32, 8>}, {pipeline_mode = #tpu.pipeline_mode<synchronous>, transform_indices = @transform_4, window_bounds = array<i64: 16, 8>}, {pipeline_mode = #tpu.pipeline_mode<synchronous>, transform_indices = @transform_5, window_bounds = array<i64: 1, 8>}, {pipeline_mode = #tpu.pipeline_mode<synchronous>, transform_indices = @transform_6, window_bounds = array<i64: 1, 8>}, {transform_indices = @transform_7, window_bounds = array<i64: 1, 8, 16>}]} {
    %c16_i32 = arith.constant 16 : i32
    %0 = arith.muli %arg1, %c16_i32 : i32
    %c0 = arith.constant 0 : index
    %c0_0 = arith.constant 0 : index
    %c0_1 = arith.constant 0 : index
    %c0_2 = arith.constant 0 : index
    %1 = vector.load %arg2[%c0, %c0_0, %c0_1, %c0_2] : memref<1x1x28x4xf32, #tpu.memory_space<vmem>>, vector<1x1x28x4xf32>
    %2 = vector.shape_cast %1 : vector<1x1x28x4xf32> to vector<28x4xf32>
    %3 = arith.truncf %2 : vector<28x4xf32> to vector<28x4xbf16>
    %c0_3 = arith.constant 0 : index
    %c0_4 = arith.constant 0 : index
    %4 = vector.load %arg3[%c0_3, %c0_4] : memref<4x16xbf16, #tpu.memory_space<vmem>>, vector<4x16xbf16>
    %cst = arith.constant dense<0.000000e+00> : vector<28x16xf32>
    %5 = tpu.matmul %3, %4, %cst {dimension_numbers = #tpu.dot_dimension_numbers<[1], [0], [0], [1], [0, 0, 1, 1], [], []>} : vector<28x4xbf16>, vector<4x16xbf16>, vector<28x16xf32> -> vector<28x16xf32>
    %6 = vector.extract_strided_slice %5 {offsets = [0, 0], sizes = [28, 8], strides = [1, 1]} : vector<28x16xf32> to vector<28x8xf32>
    %7 = vector.extract_strided_slice %5 {offsets = [5, 8], sizes = [16, 8], strides = [1, 1]} : vector<28x16xf32> to vector<16x8xf32>
    %c0_5 = arith.constant 0 : index
    %c0_6 = arith.constant 0 : index
    %8 = vector.load %arg4[%c0_5, %c0_6] : memref<72x8xbf16, #tpu.memory_space<vmem>>, vector<72x8xbf16>
    %9 = arith.truncf %6 : vector<28x8xf32> to vector<28x8xbf16>
    %10 = vector.extract_strided_slice %9 {offsets = [0, 0], sizes = [20, 8], strides = [1, 1]} : vector<28x8xbf16> to vector<20x8xbf16>
    %11 = vector.extract_strided_slice %9 {offsets = [1, 0], sizes = [20, 8], strides = [1, 1]} : vector<28x8xbf16> to vector<20x8xbf16>
    %12 = vector.extract_strided_slice %9 {offsets = [2, 0], sizes = [20, 8], strides = [1, 1]} : vector<28x8xbf16> to vector<20x8xbf16>
    %13 = vector.extract_strided_slice %9 {offsets = [3, 0], sizes = [20, 8], strides = [1, 1]} : vector<28x8xbf16> to vector<20x8xbf16>
    %14 = vector.extract_strided_slice %9 {offsets = [4, 0], sizes = [20, 8], strides = [1, 1]} : vector<28x8xbf16> to vector<20x8xbf16>
    %15 = vector.extract_strided_slice %9 {offsets = [5, 0], sizes = [20, 8], strides = [1, 1]} : vector<28x8xbf16> to vector<20x8xbf16>
    %16 = vector.extract_strided_slice %9 {offsets = [6, 0], sizes = [20, 8], strides = [1, 1]} : vector<28x8xbf16> to vector<20x8xbf16>
    %17 = vector.extract_strided_slice %9 {offsets = [7, 0], sizes = [20, 8], strides = [1, 1]} : vector<28x8xbf16> to vector<20x8xbf16>
    %18 = vector.extract_strided_slice %9 {offsets = [8, 0], sizes = [20, 8], strides = [1, 1]} : vector<28x8xbf16> to vector<20x8xbf16>
    %19 = tpu.concatenate %10, %11, %12, %13, %14, %15, %16, %17, %18 in 1 : vector<20x8xbf16>, vector<20x8xbf16>, vector<20x8xbf16>, vector<20x8xbf16>, vector<20x8xbf16>, vector<20x8xbf16>, vector<20x8xbf16>, vector<20x8xbf16>, vector<20x8xbf16> -> vector<20x72xbf16>
    %cst_7 = arith.constant dense<0.000000e+00> : vector<20x8xf32>
    %20 = tpu.matmul %19, %8, %cst_7 {dimension_numbers = #tpu.dot_dimension_numbers<[1], [0], [0], [1], [0, 0, 1, 1], [], []>} : vector<20x72xbf16>, vector<72x8xbf16>, vector<20x8xf32> -> vector<20x8xf32>
    %21 = tpu.iota {dimensions = array<i32: 0>} : vector<20x1xi32>
    %c1_i32 = arith.constant 1 : i32
    %22 = arith.subi %0, %c1_i32 : i32
    %c0_i32 = arith.constant 0 : i32
    %23 = arith.subi %22, %c0_i32 : i32
    %24 = vector.broadcast %23 : i32 to vector<20x1xi32>
    %25 = arith.addi %21, %24 : vector<20x1xi32>
    %c0_i32_8 = arith.constant 0 : i32
    %26 = vector.broadcast %c0_i32_8 : i32 to vector<20x1xi32>
    %27 = arith.cmpi sge, %25, %26 : vector<20x1xi32>
    %c16_i32_9 = arith.constant 16 : i32
    %28 = vector.broadcast %c16_i32_9 : i32 to vector<20x1xi32>
    %29 = arith.cmpi slt, %25, %28 : vector<20x1xi32>
    %30 = arith.andi %27, %29 : vector<20x1xi1>
    %cst_10 = arith.constant 0.000000e+00 : f32
    %31 = vector.shape_cast %30 : vector<20x1xi1> to vector<20x1xi1>
    %32 = vector.broadcast %31 : vector<20x1xi1> to vector<20x8xi1>
    %33 = vector.broadcast %cst_10 : f32 to vector<20x8xf32>
    %34 = arith.select %32, %20, %33 : vector<20x8xi1>, vector<20x8xf32>
    %c0_11 = arith.constant 0 : index
    %c0_12 = arith.constant 0 : index
    %35 = vector.load %arg5[%c0_11, %c0_12] : memref<32x8xbf16, #tpu.memory_space<vmem>>, vector<32x8xbf16>
    %36 = arith.truncf %34 : vector<20x8xf32> to vector<20x8xbf16>
    %37 = vector.extract_strided_slice %36 {offsets = [0, 0], sizes = [17, 8], strides = [1, 1]} : vector<20x8xbf16> to vector<17x8xbf16>
    %38 = vector.extract_strided_slice %36 {offsets = [1, 0], sizes = [17, 8], strides = [1, 1]} : vector<20x8xbf16> to vector<17x8xbf16>
    %39 = vector.extract_strided_slice %36 {offsets = [2, 0], sizes = [17, 8], strides = [1, 1]} : vector<20x8xbf16> to vector<17x8xbf16>
    %40 = vector.extract_strided_slice %36 {offsets = [3, 0], sizes = [17, 8], strides = [1, 1]} : vector<20x8xbf16> to vector<17x8xbf16>
    %41 = tpu.concatenate %37, %38, %39, %40 in 1 : vector<17x8xbf16>, vector<17x8xbf16>, vector<17x8xbf16>, vector<17x8xbf16> -> vector<17x32xbf16>
    %cst_13 = arith.constant dense<0.000000e+00> : vector<17x8xf32>
    %42 = tpu.matmul %41, %35, %cst_13 {dimension_numbers = #tpu.dot_dimension_numbers<[1], [0], [0], [1], [0, 0, 1, 1], [], []>} : vector<17x32xbf16>, vector<32x8xbf16>, vector<17x8xf32> -> vector<17x8xf32>
    %43 = vector.extract_strided_slice %25 {offsets = [0, 0], sizes = [17, 1], strides = [1, 1]} : vector<20x1xi32> to vector<17x1xi32>
    %c1_i32_14 = arith.constant 1 : i32
    %44 = vector.broadcast %c1_i32_14 : i32 to vector<17x1xi32>
    %45 = arith.addi %43, %44 : vector<17x1xi32>
    %c0_i32_15 = arith.constant 0 : i32
    %46 = vector.broadcast %c0_i32_15 : i32 to vector<17x1xi32>
    %47 = arith.cmpi sge, %45, %46 : vector<17x1xi32>
    %c16_i32_16 = arith.constant 16 : i32
    %48 = vector.broadcast %c16_i32_16 : i32 to vector<17x1xi32>
    %49 = arith.cmpi slt, %45, %48 : vector<17x1xi32>
    %50 = arith.andi %47, %49 : vector<17x1xi1>
    %cst_17 = arith.constant 0.000000e+00 : f32
    %51 = vector.shape_cast %50 : vector<17x1xi1> to vector<17x1xi1>
    %52 = vector.broadcast %51 : vector<17x1xi1> to vector<17x8xi1>
    %53 = vector.broadcast %cst_17 : f32 to vector<17x8xf32>
    %54 = arith.select %52, %42, %53 : vector<17x8xi1>, vector<17x8xf32>
    %c0_18 = arith.constant 0 : index
    %c0_19 = arith.constant 0 : index
    %55 = vector.load %arg6[%c0_18, %c0_19] : memref<16x8xbf16, #tpu.memory_space<vmem>>, vector<16x8xbf16>
    %56 = arith.truncf %54 : vector<17x8xf32> to vector<17x8xbf16>
    %57 = vector.extract_strided_slice %56 {offsets = [0, 0], sizes = [16, 8], strides = [1, 1]} : vector<17x8xbf16> to vector<16x8xbf16>
    %58 = vector.extract_strided_slice %56 {offsets = [1, 0], sizes = [16, 8], strides = [1, 1]} : vector<17x8xbf16> to vector<16x8xbf16>
    %59 = tpu.concatenate %57, %58 in 1 : vector<16x8xbf16>, vector<16x8xbf16> -> vector<16x16xbf16>
    %cst_20 = arith.constant dense<0.000000e+00> : vector<16x8xf32>
    %60 = tpu.matmul %59, %55, %cst_20 {dimension_numbers = #tpu.dot_dimension_numbers<[1], [0], [0], [1], [0, 0, 1, 1], [], []>} : vector<16x16xbf16>, vector<16x8xbf16>, vector<16x8xf32> -> vector<16x8xf32>
    %c0_21 = arith.constant 0 : index
    %c0_22 = arith.constant 0 : index
    %61 = vector.load %arg7[%c0_21, %c0_22] : memref<1x8xf32, #tpu.memory_space<vmem>>, vector<1x8xf32>
    %62 = vector.broadcast %61 : vector<1x8xf32> to vector<16x8xf32>
    %63 = arith.addf %60, %62 : vector<16x8xf32>
    %cst_23 = arith.constant 0.000000e+00 : f32
    %64 = vector.broadcast %cst_23 : f32 to vector<16x8xf32>
    %65 = arith.maximumf %63, %64 : vector<16x8xf32>
    %c0_24 = arith.constant 0 : index
    %c0_25 = arith.constant 0 : index
    %66 = vector.load %arg8[%c0_24, %c0_25] : memref<1x8xf32, #tpu.memory_space<vmem>>, vector<1x8xf32>
    %67 = vector.broadcast %66 : vector<1x8xf32> to vector<16x8xf32>
    %68 = arith.addf %7, %67 : vector<16x8xf32>
    %cst_26 = arith.constant 0.000000e+00 : f32
    %69 = vector.broadcast %cst_26 : f32 to vector<16x8xf32>
    %70 = arith.maximumf %68, %69 : vector<16x8xf32>
    %71 = arith.addf %65, %70 : vector<16x8xf32>
    %72 = tpu.transpose %71, [1, 0] : vector<16x8xf32> -> vector<8x16xf32>
    %c0_27 = arith.constant 0 : index
    %c0_28 = arith.constant 0 : index
    %c0_29 = arith.constant 0 : index
    %73 = vector.load %arg9[%c0_27, %c0_28, %c0_29] : memref<1x8x16xf32, #tpu.memory_space<vmem>>, vector<1x8x16xf32>
    %74 = vector.shape_cast %73 : vector<1x8x16xf32> to vector<8x16xf32>
    %75 = vector.shape_cast %72 : vector<8x16xf32> to vector<1x8x16xf32>
    tpu.vector_store %arg9[%c0_27, %c0_28, %c0_29], %75 {strides = array<i32>} : memref<1x8x16xf32, #tpu.memory_space<vmem>>, vector<1x8x16xf32>,
    return
  }
  func.func @transform_0(%arg0: i32, %arg1: i32) -> (i32, i32, i32, i32) {
    %c0_i32 = arith.constant 0 : i32
    %c0_i32_0 = arith.constant 0 : i32
    %c0_i32_1 = arith.constant 0 : i32
    return %arg0, %arg1, %c0_i32, %c0_i32_0 : i32, i32, i32, i32
  }
  func.func @transform_1(%arg0: i32, %arg1: i32) -> (i32, i32) {
    %c0_i32 = arith.constant 0 : i32
    %c0_i32_0 = arith.constant 0 : i32
    %c0_i32_1 = arith.constant 0 : i32
    return %c0_i32, %c0_i32_0 : i32, i32
  }
  func.func @transform_2(%arg0: i32, %arg1: i32) -> (i32, i32) {
    %c0_i32 = arith.constant 0 : i32
    %c0_i32_0 = arith.constant 0 : i32
    %c0_i32_1 = arith.constant 0 : i32
    return %c0_i32, %c0_i32_0 : i32, i32
  }
  func.func @transform_3(%arg0: i32, %arg1: i32) -> (i32, i32) {
    %c0_i32 = arith.constant 0 : i32
    %c0_i32_0 = arith.constant 0 : i32
    %c0_i32_1 = arith.constant 0 : i32
    return %c0_i32, %c0_i32_0 : i32, i32
  }
  func.func @transform_4(%arg0: i32, %arg1: i32) -> (i32, i32) {
    %c0_i32 = arith.constant 0 : i32
    %c0_i32_0 = arith.constant 0 : i32
    %c0_i32_1 = arith.constant 0 : i32
    return %c0_i32, %c0_i32_0 : i32, i32
  }
  func.func @transform_5(%arg0: i32, %arg1: i32) -> (i32, i32) {
    %c0_i32 = arith.constant 0 : i32
    %c0_i32_0 = arith.constant 0 : i32
    %c0_i32_1 = arith.constant 0 : i32
    return %c0_i32, %c0_i32_0 : i32, i32
  }
  func.func @transform_6(%arg0: i32, %arg1: i32) -> (i32, i32) {
    %c0_i32 = arith.constant 0 : i32
    %c0_i32_0 = arith.constant 0 : i32
    %c0_i32_1 = arith.constant 0 : i32
    return %c0_i32, %c0_i32_0 : i32, i32
  }
  func.func @transform_7(%arg0: i32, %arg1: i32) -> (i32, i32, i32) {
    %c0_i32 = arith.constant 0 : i32
    %c0_i32_0 = arith.constant 0 : i32
    return %arg0, %c0_i32, %arg1 : i32, i32, i32
  }
}

</mosaic_0001>

<bundles_post_ra>
// kernel: tpu_custom_call.1
= control target key start
LH: loop header
LB: loop body
LE: loop exit
PB: predicated region body
PF: predicated region fallthrough
CT: control target
= control target key end

     0   :  { %12 = vsyncpa [#allocation3], 0  ;;  %s1522_s0 = inlined_call_operand.vmem [shape: f32[2,1,28,4], index: 0, kind: input, shape index: {}]   ;;  %s1523_s1 = inlined_call_operand.vmem [shape: bf16[4,16], index: 1, kind: input, shape index: {}]   ;;  %s1524_s2 = inlined_call_operand.vmem [shape: bf16[72,8], index: 2, kind: input, shape index: {}]   ;;  %s1525_s3 = inlined_call_operand.vmem [shape: bf16[32,8], index: 3, kind: input, shape index: {}]   ;;  %s1526_s4 = inlined_call_operand.vmem [shape: bf16[16,8], index: 4, kind: input, shape index: {}]   ;;  %s1527_s5 = inlined_call_operand.vmem [shape: f32[1,8], index: 5, kind: input, shape index: {}]   ;;  %s1528_s6 = inlined_call_operand.vmem [shape: f32[1,8], index: 6, kind: input, shape index: {}]   ;;  %s1529_s7 = inlined_call_operand.hbm [shape: f32[2,8,16], index: 7, kind: output, shape index: {}]  }
   0x1   :  { %14 = vsyncpa [#allocation3 + $0x1], 0  ;;  %s1292_s24 = smov 0   ;;  %s1294_s25 = smov 0  }
   0x2   :  { %s1296_s26 = smov 0   ;;  %s1298_s27 = smov 0  }
   0x3   :  { %s1300_s28 = smov 0   ;;  %s1302_s29 = smov 0  }
   0x4 LB: > { %s1002_s30 = sadd.s32 4294967295, %s1237_s29   ;;  %s1003_s8 = sadd.s32 4294967294, %s1237_s29   ;;  %s1237_s29 = sphi %s1302_s29, %s20_s29   ;;  %s1233_s28 = sphi %s1300_s28, %s1536_s28   ;;  %s1229_s27 = sphi %s1298_s27, %s1535_s27   ;;  %s1225_s26 = sphi %s1296_s26, %s1534_s26   ;;  %s1221_s25 = sphi %s1294_s25, %s1533_s25   ;;  %s1217_s24 = sphi %s1292_s24, %s1532_s24  }
   0x5   : > { %s32_s9 = sadd.s32 1, %s1233_s28  ;;  %s195_s10 = sadd.s32 1, %s1225_s26 }
   0x6   : > { %p34_p0 = scmp.ge.s32.totalorder %s32_s9, 2  ;;  %p205_p1 = scmp.ne.s32.totalorder %s1225_s26, %s1221_s25 }
   0x7   : > { %p206_p2 = scmp.eq.s32.totalorder %s1002_s30, 1  ;;  %p211_p3 = scmp.ne.s32.totalorder %s1221_s25, %s1217_s24 }
   0x8   : > { %s1538_s9 = smov (%p34_p0, %s32_s9), 0  ;;  %p212_p5 = scmp.eq.s32.totalorder %s1003_s8, 1 }
   0x9   : > { %p1332_p4 = por %p206_p2, %p205_p1  ;;  %s190_s12 = ssub.s32 %s1233_s28, %s1538_s9 }
   0xa   : > { %p1006_p6 = scmp.ge.s32.totalorder %s1237_s29, 1  ;;  %p193_p7 = scmp.eq.s32.totalorder %s190_s12, 0 }
   0xb   : > { %p1339_p8 = por %p212_p5, %p211_p3  ;;  %p260_p9 = scmp.lt.s32.totalorder %s1237_s29, 3 }
   0xc   : > { %s1345_s14 = scalar_select %p193_p7, %s1225_s26, %s195_s10  }
   0xd   : > { %p261_p10 = pnand %p1006_p6, %p260_p9 }
   0xe   : > { %v313_v0 = vld [vmem:[%s1523_s1] sm:$0x3] (!%p261_p10)  ;;  %vm321_vm0 = vcmask (!%p261_p10), 1041408   ;;  %p296_p11 = scmp.lt.s32.totalorder (!%p261_p10), %s1229_s27, 1  ;;  %vm314_vm1 = vcmask (!%p261_p10), 31744   ;;  %vm427_vm2 = vcmask (!%p261_p10), 1045504  }
   0xf   : > { %264 = sbr.rel (%p261_p10) target bundleno = 1441 (0x5a1), region = 48  ;;  %1082 = vmatprep.subr.msk.bf16.mxu0 (!%p261_p10), %vm321_vm0, %v313_v0  ;;  %v323_v1 = vsel (!%p261_p10), %vm321_vm0, %v313_v0, 0  ;;  %v1151_v16 = vld [vmem:[%s1524_s2] sm:$0xff] (!%p261_p10)   ;;  %s1239_s30 = smov (!%p261_p10), 16   ;;  %vm447_vm3 = vcmask (!%p261_p10), 1044480   ;;  %v1152_v23 = vld [vmem:[%s1524_s2 + $0x8] sm:$0xff] (!%p261_p10)  }
  0x10   : > { %1049 = vmatpush3.bf16.msra.mxu0 (!%p261_p10), %v323_v1  ;;  %1054 = vmatprep.subr.bf16.mxu1 (!%p261_p10), %v1151_v16  ;;  %s1240_s8 = smov (!%p261_p10), 32   ;;  %s1241_s15 = smov (!%p261_p10), 48   ;;  %v1153_v30 = vld [vmem:[%s1524_s2 + $0x10] sm:$0xff] (!%p261_p10)   ;;  %vm407_vm4 = vcmask (!%p261_p10), 1046528   ;;  %vm385_vm5 = vsmask.f32 (!%p261_p10), 7424 }
  0x11   : > { %1055 = vmatpush3.bf16.msra.mxu1 (!%p261_p10), %v1151_v16  ;;  %v1154_v38 = vld [vmem:[%s1524_s2 + $0x18] sm:$0xff] (!%p261_p10)   ;;  %vm415_vm6 = vsmask.f32 (!%p261_p10), 6400  ;;  %vm467_vm7 = vcmask (!%p261_p10), 1043456   ;;  %v1155_v46 = vld [vmem:[%s1524_s2 + $0x20] ss:$0 sps:$4 sm:$0xff] (!%p261_p10)  }
  0x12   : > { %1056 = vmatprep.subr.bf16.mxu1 (!%p261_p10), %v1152_v23  ;;  %s1243_s23 = smov (!%p261_p10), 24   ;;  %v549_v54 = vsel (!%p261_p10), %vm467_vm7, %v1155_v46, 0  ;;  %vm435_vm8 = vsmask.f32 (!%p261_p10), 5376  ;;  %vm455_vm9 = vsmask.f32 (!%p261_p10), 4352 }
  0x13   : > { %s1245_s10 = smov (!%p261_p10), 56   ;;  %s1246_s12 = smov (!%p261_p10), 64   ;;  %vm475_vm10 = vcmask (!%p261_p10), 64512   ;;  %vm480_vm11 = vcmask (!%p261_p10), 130048   ;;  %vm485_vm12 = vcmask (!%p261_p10), 195584   ;;  %vm490_vm13 = vcmask (!%p261_p10), 261120  }
  0x14   : > { %vm495_vm14 = vcmask (!%p261_p10), 326656   ;;  %vm500_vm15 = vcmask (!%p261_p10), 392192   ;;  %vm505_vm0 = vcmask (!%p261_p10), 457728  }
  0x15   : > { %1057 = vmatpush3.bf16.msra.mxu1 (!%p261_p10), %v1152_v23 }
  0x16   : > { %s297_s17 = scalar_select %p296_p11, %s1229_s27, 1  ;;  %1058 = vmatprep.subr.bf16.mxu1 %v1153_v30 }
  0x18   : > { %s1031_s18 = sshll.u32 %s297_s17, 5 }
  0x19   : > { %s304_s21 = scalar_lea.vmem %s1522_s0, %s1031_s18  ;;  %s1242_s18 = smov 8   ;;  %1059 = vmatpush3.bf16.msra.mxu1 %v1153_v30 }
  0x1a   : > { %v307_v2 = vld [vmem:[%s304_s21] sm:$0xff]  ;;  %v308_v3 = vld [vmem:[%s304_s21 + $0x8] sm:$0xff]  ;;  %v309_v4 = vld [vmem:[%s304_s21 + $0x10] sm:$0xff]  ;;  %1060 = vmatprep.subr.bf16.mxu1 %v1154_v38 }
  0x1b   : > { %v311_v5 = vpack.c.bf16 %v308_v3, %v307_v2  ;;  %v310_v6 = vld [vmem:[%s304_s21 + $0x18] sm:$0xf] }
  0x1c   : > { %v312_v7 = vpack.c.bf16 %v310_v6, %v309_v4 }
  0x1d   : > { %1050 = vmatprep.mubr.msk.bf16.mxu0 %vm314_vm1, %v311_v5  ;;  %1061 = vmatpush3.bf16.msra.mxu1 %v1154_v38  ;;  %v1156_v38 = vld [vmem:[%s1525_s3] sm:$0xff]  }
  0x1e   : > { %1051 = vmatmul.mubr.msk.bf16.vlgmr.msra.gmra.mrb[0].mxu0 %vm314_vm1, %v312_v7  ;;  %1083 = vmatprep.subr.msk.bf16.mxu1 %vm467_vm7, %v1155_v46  ;;  %vm510_vm1 = vcmask 523264  }
  0x1f   : > { %1068 = vmatprep.subr.bf16.mxu0 %v1156_v38 }
  0x20   : > { %1069 = vmatpush3.bf16.msra.mxu0 %v1156_v38 }
  0x21   : > { %1063 = vmatpush3.bf16.msra.mxu1 %v549_v54 }
  0xf1   : > { %v1355_v8 = vpop.f32.mrb[0].mxu0 }
  0xf2   : > { %v1357_v9 = vpop.f32.mrb[1].mxu0 }
  0xf3   : > { %v1053_v10 = vpop.f32.mrb[2].mxu0 }
  0xf4   : > { %v1360_v11 = vpack.c.bf16 %v1053_v10, %v1355_v8  ;;  %v1362_v12 = vpop.f32.mrb[3].mxu0 }
  0xf5   : > { %v1366_v13 = vpack.c.bf16 %v1362_v12, %v1357_v9 }
  0xf6   : > { %v409_v14 = vrot.slane %v1360_v11, 1  ;;  %v429_v15 = vrot.slane %v1360_v11, 2  ;;  %v1376_v18 = vshll.u32 %v1360_v11, 16  ;;  %v449_v21 = vrot.slane %v1360_v11, 3 }
  0xf7   : > { %v428_v17 = vrot.slane %v1366_v13, 2  ;;  %v448_v20 = vrot.slane %v1366_v13, 3  ;;  %v1381_v22 = vshll.u32 %v1366_v13, 16  ;;  %v398_v25 = vshrl.u32 %v1360_v11, 16 }
  0xf8   : > { %413 = vrot.lane.b32.xlu1 %v409_v14, %s1239_s30  ;;  %v396_v24 = vrot.slane %v1376_v18, 1  ;;  %v387_v27 = vshrl.u32 %v1366_v13, 16  ;;  %v408_v29 = vrot.slane %v1366_v13, 1  ;;  %v420_v33 = vrot.slane %v1376_v18, 2 }
  0xf9   : > { %v430_v19 = vsel %vm427_vm2, %v428_v17, %v429_v15  ;;  %v450_v26 = vsel %vm447_vm3, %v448_v20, %v449_v21  ;;  %v391_v28 = vrot.slane %v1381_v22, 1  ;;  %v419_v32 = vrot.slane %v398_v25, 1 }
  0xfa   : > { %431 = vrot.lane.b32.xlu0 %v430_v19, %s1240_s8  ;;  %v400_v31 = vor.u32 %v398_v25, %v396_v24  ;;  %v416_v35 = vrot.slane %v387_v27, 1  ;;  %v417_v36 = vrot.slane %v1381_v22, 2  ;;  %v410_v37 = vsel %vm407_vm4, %v408_v29, %v409_v14 }
  0xfb   : > { %v392_v34 = vor.u32 %v391_v28, %v387_v27  ;;  %v421_v39 = vor.u32 %v420_v33, %v419_v32  ;;  %v439_v40 = vrot.slane %v398_v25, 2  ;;  %v440_v41 = vrot.slane %v1376_v18, 3 }
  0xfc   : > { %433 = vrot.lane.b32.xlu1 %v429_v15, %s1240_s8  ;;  %v418_v43 = vor.u32 %v417_v36, %v416_v35  ;;  %v436_v44 = vrot.slane %v387_v27, 2  ;;  %v437_v45 = vrot.slane %v1381_v22, 3  ;;  %v459_v48 = vrot.slane %v398_v25, 3  ;;  %s1244_s8 = smov 40  }
  0xfd   : > { %v397_v42 = vsel %vm385_vm5, %v392_v34, %v396_v24  ;;  %v441_v47 = vor.u32 %v440_v41, %v439_v40  ;;  %v460_v49 = vrot.slane %v1376_v18, 4  ;;  %v456_v50 = vrot.slane %v387_v27, 3 }
  0xfe   : > { %451 = vrot.lane.b32.xlu0 %v450_v26, %s1241_s15  ;;  %v422_v51 = vsel %vm415_vm6, %v418_v43, %v421_v39  ;;  %v438_v52 = vor.u32 %v437_v45, %v436_v44  ;;  %v457_v53 = vrot.slane %v1381_v22, 4  ;;  %v469_v59 = vrot.slane %v1360_v11, 4 }
  0xff   : > { %v461_v56 = vor.u32 %v460_v49, %v459_v48  ;;  %v468_v60 = vrot.slane %v1366_v13, 4  ;;  %vm542_vm2 = vcmask 588800   ;;  %v599_v33 = vlaneseq }
 0x100   : > { %453 = vrot.lane.b32.xlu1 %v449_v21, %s1241_s15  ;;  %v442_v55 = vsel %vm435_vm8, %v438_v52, %v441_v47  ;;  %v458_v57 = vor.u32 %v457_v53, %v456_v50  ;;  %s1028_s15 = sshll.u32 %s1229_s27, 7  ;;  %s1251_s27 = smov [#allocation2]  }
 0x101   : > { %v470_v61 = vsel %vm467_vm7, %v468_v60, %v469_v59  ;;  %v600_v34 = vshrl.u32 %v599_v33, 7  ;;  %s1474_s21 = scalar_lea.hbm %s1529_s7, %s1028_s15 }
 0x102   : > { %403 = vrot.lane.b32.xlu0 %v400_v31, %s1242_s18  ;;  %v462_v58 = vsel %vm455_vm9, %v458_v57, %v461_v56 }
 0x103   : > { %v602_v35 = vadd.s32 16, %v600_v34 }
 0x104   : > { %411 = vrot.lane.b32.xlu1 %v410_v37, %s1239_s30  ;;  %v605_v37 = vadd.s32 4294967295, %v600_v34 }
 0x105   : > { %v607_v36 = vadd.s32 4294967295, %v602_v35 }
 0x106   : > { %401 = vrot.lane.b32.xlu0 %v397_v42, %s1242_s18  ;;  %vm608_vm7 = vcmp.ge.s32.totalorder %v605_v37, 0  ;;  %v1157_v42 = vld [vmem:[%s1525_s3 + $0x8] sm:$0xff]   ;;  %v1250_v37 = vmov 0  }
 0x107   : > { %vm613_vm3 = vcmp.lt.s32.totalorder %v607_v36, 16  ;;  %1070 = vmatprep.subr.bf16.mxu0 %v1157_v42  ;;  %v781_v38 = vrot.slane %v1250_v37, 1 }
 0x108   : > { %425 = vrot.lane.b32.xlu1 %v421_v39, %s1243_s23  ;;  %1071 = vmatpush3.bf16.msra.mxu0 %v1157_v42 }
 0x10a   : > { %423 = vrot.lane.b32.xlu0 %v422_v51, %s1243_s23 }
 0x10c   : > { %445 = vrot.lane.b32.xlu1 %v441_v47, %s1244_s8 }
 0x10e   : > { %443 = vrot.lane.b32.xlu0 %v442_v55, %s1244_s8 }
 0x110   : > { %465 = vrot.lane.b32.xlu1 %v461_v56, %s1245_s10 }
 0x112   : > { %463 = vrot.lane.b32.xlu0 %v462_v58, %s1245_s10 }
 0x114   : > { %473 = vrot.lane.b32.xlu1 %v469_v59, %s1246_s12 }
 0x116   : > { %471 = vrot.lane.b32.xlu0 %v470_v61, %s1246_s12 }
 0x16a   : > { %v414_v62 = vpop.permute.xlu1 %413 }
 0x16c   : > { %v432_v63 = vpop.permute.xlu0 %431 }
 0x16e   : > { %v434_v0 = vpop.permute.xlu1 %433 }
 0x170   : > { %v452_v1 = vpop.permute.xlu0 %451 }
 0x172   : > { %v454_v2 = vpop.permute.xlu1 %453 }
 0x174   : > { %v404_v3 = vpop.permute.xlu0 %403 }
 0x175   : > { %v479_v14 = vsel %vm475_vm10, %v1360_v11, %v404_v3 }
 0x176   : > { %v412_v4 = vpop.permute.xlu1 %411  ;;  %v484_v17 = vsel %vm480_vm11, %v479_v14, %v414_v62 }
 0x178   : > { %v402_v5 = vpop.permute.xlu0 %401 }
 0x179   : > { %v477_v7 = vsel %vm475_vm10, %v1366_v13, %v402_v5 }
 0x17a   : > { %v426_v6 = vpop.permute.xlu1 %425  ;;  %v482_v16 = vsel %vm480_vm11, %v477_v7, %v412_v4 }
 0x17b   : > { %v489_v20 = vsel %vm485_vm12, %v484_v17, %v426_v6 }
 0x17c   : > { %v424_v10 = vpop.permute.xlu0 %423  ;;  %v494_v22 = vsel %vm490_vm13, %v489_v20, %v434_v0 }
 0x17d   : > { %v487_v18 = vsel %vm485_vm12, %v482_v16, %v424_v10 }
 0x17e   : > { %v446_v15 = vpop.permute.xlu1 %445  ;;  %v492_v13 = vsel %vm490_vm13, %v487_v18, %v432_v63 }
 0x17f   : > { %v499_v24 = vsel %vm495_vm14, %v494_v22, %v446_v15 }
 0x180   : > { %v444_v19 = vpop.permute.xlu0 %443  ;;  %v504_v27 = vsel %vm500_vm15, %v499_v24, %v454_v2 }
 0x181   : > { %v497_v11 = vsel %vm495_vm14, %v492_v13, %v444_v19 }
 0x182   : > { %v466_v21 = vpop.permute.xlu1 %465  ;;  %v502_v25 = vsel %vm500_vm15, %v497_v11, %v452_v1  ;;  %v1026_v1 = vld [vmem:[%s1528_s6] ss:$0 sm:$0xff] }
 0x183   : > { %v509_v30 = vsel %vm505_vm0, %v504_v27, %v466_v21 }
 0x184   : > { %v464_v23 = vpop.permute.xlu0 %463 }
 0x185   : > { %v507_v28 = vsel %vm505_vm0, %v502_v25, %v464_v23 }
 0x186   : > { %v474_v26 = vpop.permute.xlu1 %473 }
 0x187   : > { %v514_v32 = vsel %vm510_vm1, %v509_v30, %v474_v26 }
 0x188   : > { %v472_v29 = vpop.permute.xlu0 %471 }
 0x189   : > { %v512_v31 = vsel %vm510_vm1, %v507_v28, %v472_v29 }
 0x18a   : > { %1064 = vmatprep.mubr.msk.bf16.mxu1 %vm542_vm2, %v512_v31 }
 0x18b   : > { %1065 = vmatmul.mubr.msk.bf16.vlgmr.msra.gmra.mrb[0].mxu1 %vm542_vm2, %v514_v32 }
 0x25e   : > { %v1066_v39 = vpop.f32.mrb[0].mxu1 }
 0x25f   : > { %v625_v40 = vsel %vm613_vm3, %v1066_v39, 0.0  ;;  %v585_v41 = vpop.f32.mrb[1].mxu1 }
 0x260   : > { %v631_v43 = vpack.c.bf16 %v625_v40, %v625_v40  ;;  %v623_v44 = vsel %vm608_vm7, %v585_v41, 0.0  ;;  %v1067_v45 = vpop.f32.mrb[2].mxu1 }
 0x261   : > { %v588_v46 = vpop.f32.mrb[3].mxu1 }
 0x262   : > { %v630_v47 = vpack.c.bf16 %v588_v46, %v623_v44  ;;  %v644_v48 = vshrl.u32 %v631_v43, 16  ;;  %v653_v49 = vrot.slane %v631_v43, 1  ;;  %v640_v53 = vshll.u32 %v631_v43, 16 }
 0x264   : > { %v635_v50 = vshll.u32 %v630_v47, 16  ;;  %648 = vrot.lane.b32.xlu1 %v644_v48, %s1242_s18  ;;  %v652_v51 = vrot.slane %v630_v47, 1  ;;  %v633_v52 = vshrl.u32 %v630_v47, 16  ;;  %v642_v59 = vrot.slane %v640_v53, 1 }
 0x265   : > { %v662_v60 = vrot.slane %v644_v48, 1  ;;  %v663_v61 = vrot.slane %v640_v53, 2 }
 0x266   : > { %v654_v54 = vsel %vm407_vm4, %v652_v51, %v653_v49  ;;  %v637_v55 = vrot.slane %v635_v50, 1  ;;  %v659_v56 = vrot.slane %v633_v52, 1  ;;  %v660_v57 = vrot.slane %v635_v50, 2 }
 0x267   : > { %655 = vrot.lane.b32.xlu0 %v654_v54, %s1239_s30  ;;  %v664_v0 = vor.u32 %v663_v61, %v662_v60  ;;  %vm863_vm4 = vcmask 1042432  }
 0x268   : > { %657 = vrot.lane.b32.xlu1 %v653_v49, %s1239_s30  ;;  %v638_v58 = vor.u32 %v637_v55, %v633_v52  ;;  %v661_v63 = vor.u32 %v660_v57, %v659_v56  ;;  %s1247_s30 = smov 120  }
 0x26a   : > { %v643_v62 = vsel %vm385_vm5, %v638_v58, %v642_v59  ;;  %v665_v2 = vsel %vm415_vm6, %v661_v63, %v664_v0  ;;  %vm1249_vm6 = vmmov 0  }
 0x26b   : > { %646 = vrot.lane.b32.xlu0 %v643_v62, %s1242_s18 }
 0x26c   : > { %668 = vrot.lane.b32.xlu1 %v662_v60, %s1243_s23 }
 0x26f   : > { %666 = vrot.lane.b32.xlu0 %v665_v2, %s1243_s23  ;;  %s1163_s23 = sshll.u32 %s1251_s27, 4  ;;  %s1164_s23 = int_to_ptr.vmem [resolvable:$false] %s1163_s23 }
 0x270   : > { %851 = vrot.lane.b32.xlu1 %v1026_v1, %s1242_s18  ;;  %s1165_s8 = scalar_lea.vmem %s1164_s23, 256 }
 0x2d6   : > { %v649_v3 = vpop.permute.xlu1 %648 }
 0x2d7   : > { %v673_v14 = vsel %vm475_vm10, %v631_v43, %v649_v3  ;;  %v1023_v43 = vld [vmem:[%s1527_s5] ss:$0 sm:$0xff] }
 0x2d9   : > { %v656_v4 = vpop.permute.xlu0 %655 }
 0x2da   : > { %v658_v5 = vpop.permute.xlu1 %657 }
 0x2db   : > { %v677_v17 = vsel %vm480_vm11, %v673_v14, %v658_v5 }
 0x2dd   : > { %v647_v6 = vpop.permute.xlu0 %646 }
 0x2de   : > { %v671_v7 = vsel %vm475_vm10, %v630_v47, %v647_v6  ;;  %v669_v10 = vpop.permute.xlu1 %668 }
 0x2df   : > { %v675_v15 = vsel %vm480_vm11, %v671_v7, %v656_v4  ;;  %v681_v20 = vsel %vm485_vm12, %v677_v17, %v669_v10 }
 0x2e1   : > { %v667_v16 = vpop.permute.xlu0 %666 }
 0x2e2   : > { %v679_v18 = vsel %vm485_vm12, %v675_v15, %v667_v16  ;;  %v852_v19 = vpop.permute.xlu1 %851 }
 0x2e3   : > { %v854_v21 = vadd.f32 %v852_v19, %v1357_v9  ;;  %v855_v13 = vadd.f32 %v852_v19, %v1362_v12  ;;  %v856_v22 = vadd.f32 %v1355_v8, %v852_v19  ;;  %1072 = vmatprep.mubr.msk.bf16.mxu0 %vm490_vm13, %v679_v18  ;;  %v1158_v9 = vld [vmem:[%s1526_s4] sm:$0xff]   ;;  %v1248_v8 = vmov 0.0  }
 0x2e4   : > { %1073 = vmatmul.mubr.msk.bf16.vlgmr.msra.gmra.mrb[4].mxu0 %vm490_vm13, %v681_v20  ;;  %1076 = vmatprep.subr.bf16.mxu0 %v1248_v8 }
 0x2e5   : > { %v857_v11 = vmax.f32 %v854_v21, 0.0  ;;  %v858_v23 = vmax.f32 %v855_v13, 0.0  ;;  %v859_v24 = vmax.f32 %v856_v22, 0.0  ;;  %1077 = vmatpush3.bf16.msra.mxu0 %v1158_v9  ;;  %1078 = vmatprep.mubr.msk.bf16.mxu0 %vm1249_vm6, %v1248_v8 }
 0x2e7   : > { %v864_v25 = vrot.slane %v857_v11, 5  ;;  %v865_v26 = vrot.slane %v858_v23, 5  ;;  %v867_v27 = vrot.slane %v859_v24, 5 }
 0x2e9   : > { %v868_v28 = vsel %vm863_vm4, %v865_v26, %v867_v27  ;;  %v866_v29 = vsel %vm863_vm4, %v864_v25, %v865_v26 }
 0x2ea   : > { %871 = vrot.lane.b32.xlu1 %v868_v28, %s1247_s30 }
 0x35c   : > { %v872_v54 = vpop.permute.xlu1 %871 }
 0x3b7   : > { %v1074_v12 = vpop.f32.mrb[4].mxu0 }
 0x3b8   : > { %v732_v30 = vpop.f32.mrb[5].mxu0 }
 0x3b9   : > { %v1075_v31 = vpop.f32.mrb[6].mxu0 }
 0x3ba   : > { %v735_v32 = vpop.f32.mrb[7].mxu0 }
 0x3bb   : > { %v769_v33 = vpack.c.bf16 %v735_v32, %v732_v30 }
 0x3bd   : > { %v774_v34 = vshll.u32 %v769_v33, 16  ;;  %v772_v35 = vshrl.u32 %v769_v33, 16 }
 0x3bf   : > { %v776_v36 = vrot.slane %v774_v34, 1 }
 0x3c1   : > { %v777_v39 = vor.u32 %v776_v36, %v772_v35 }
 0x3c3   : > { %v782_v40 = vsel %vm385_vm5, %v777_v39, %v781_v38 }
 0x3c4   : > { %783 = vrot.lane.b32.xlu0 %v782_v40, %s1242_s18  ;;  %s293_s18 = sand.u32 1, %s1221_s25  }
 0x3c5   : > { %s1007_s12 = sshll.u32 %s293_s18, 3 }
 0x3c6   : > { %s295_s16 = scalar_lea.vmem [#allocation2], %s1007_s12 }
 0x3c7   : > { %s925_s17 = sshll.u32 %s295_s16, 4  ;;  %s1476_s17 = int_to_ptr.vmem [resolvable:$true] %s925_s17 }
 0x3c8   : > { %869 = vrot.lane.b32.xlu0 %v866_v29, %s1247_s30  ;;  %s911_s30 = scalar_lea.sflag [#allocation3], %s293_s18  ;;  %s1159_s22 = scalar_lea.vmem %s1476_s17, 128 }
 0x3c9   : > { %p1160_p12 = scmp.ne.s32.totalorder %s1476_s17, %s1159_s22  ;;  %p1166_p1 = scmp.lt.s32.totalorder %s1476_s17, %s1164_s23 }
 0x3ca   : > { %p1167_p2 = scmp.lt.s32.totalorder %s1165_s8, %s1159_s22 }
 0x3cb   : > { %p1161_p13 = pnand %p1160_p12, %p1332_p4 }
 0x3cc   : > { %p1168_p3 = por %p1167_p2, %p1166_p1 }
 0x3cd   : > { %p1162_p0 = pneg %p1161_p13 }
 0x3cf   : > { %p1169_p5 = pnand %p1168_p3, %p1162_p0 }
 0x436   : > { %v784_v41 = vpop.permute.xlu0 %783 }
 0x437   : > { %v786_v42 = vsel %vm475_vm10, %v769_v33, %v784_v41 }
 0x438   : > { %1079 = vmatmul.mubr.msk.bf16.vlgmr.msra.gmra.mrb[8].mxu0 %vm480_vm11, %v786_v42 }
 0x43a   : > { %v870_v51 = vpop.permute.xlu0 %869 }
 0x50b   : > { %v836_v44 = vpop.f32.mrb[8].mxu0 }
 0x50c   : > { %v837_v45 = vadd.f32 %v1023_v43, %v836_v44  ;;  %v1080_v46 = vpop.f32.mrb[9].mxu0 }
 0x50d   : > { %v839_v47 = vpop.f32.mrb[10].mxu0 }
 0x50e   : > { %v843_v48 = vmax.f32 %v837_v45, 0.0  ;;  %v840_v49 = vadd.f32 %v1023_v43, %v839_v47  ;;  %v1081_v50 = vpop.f32.mrb[11].mxu0 }
 0x510   : > { %v844_v52 = vmax.f32 %v840_v49, 0.0  ;;  %v875_v53 = vadd.f32 %v870_v51, %v843_v48 }
 0x512   : > { %877 = vxpose.xlu0.b32.start [1/2] (short) (narrow) %v875_v53, 8  ;;  %v876_v55 = vadd.f32 %v872_v54, %v844_v52 }
 0x516   : > { %878 = vxpose.xlu0.b32.end [2/2] (short) (narrow) %v876_v55, 8 }
 0x592   : > { %v893_v56 = vpop.trf.xlu0 }
 0x593   : > { %909 = vst.msk [vmem:[%s295_s16] sm:$0xff] %vm480_vm11, %v893_v56 }
 0x594   : > { %1172 = shalt.err (!%p1169_p5)
}
 0x595   : > { %s1173_s10 = scalar_lea.hbm %s1474_s21, 128  ;;  %s1177_s15 = scalar_lea.hbm %s1529_s7, 256 }
 0x596   : > { %p1174_p6 = scmp.ne.s32.totalorder %s1474_s21, %s1173_s10  ;;  %p1178_p10 = scmp.lt.u32.totalorder %s1474_s21, %s1529_s7 }
 0x597   : > { %p1179_p11 = scmp.lt.u32.totalorder %s1177_s15, %s1173_s10  ;;  %p1181_p13 = scmp.lt.u32.totalorder %s1173_s10, %s1474_s21 }
 0x598   : > { %p1175_p7 = pnand %p1174_p6, %p1332_p4 }
 0x599   : > { %p1180_p12 = por %p1179_p11, %p1178_p10 }
 0x59a   : > { %p1176_p9 = pneg %p1175_p7 }
 0x59b   : > { %p1182_p0 = por %p1181_p13, %p1180_p12 }
 0x59d   : > { %p1183_p1 = pnand %p1182_p0, %p1176_p9 }
 0x59f   : > { %1186 = shalt.err (!%p1183_p1)
}
 0x5a0   : > { %1084 = dma.vmem_to_hbm [thread:$0]  (%p1332_p4), %s1476_s17, 128, %s1474_s21, %s911_s30  }
 0x5a1 PF: > { %p1090_p2 = scmp.ge.s32.totalorder %s1237_s29, 2  ;;  %s937_s20 = sand.u32 1, %s1217_s24  }
 0x5a2   : > { %s938_s22 = scalar_lea.sflag [#allocation3], %s937_s20 }
 0x5a3   : > { %p1087_p3 = pnand %p1090_p2, %p1339_p8 }
 0x5a5   : > { %1212 = dma.done.wait (!%p1087_p3), %s938_s22, 128  }
 0x5a6   : > { %1214 = vsyncadd (!%p1087_p3), %s938_s22, 4294967168  ;;  %s20_s29 = sadd.s32 1, %s1237_s29   ;;  %s1532_s24 = smov %s1221_s25 }
 0x5a7   : > { %p17_p5 = scmp.ge.s32.totalorder %s20_s29, 4   ;;  %s1533_s25 = smov %s1225_s26 }
 0x5a8   : > { %s1534_s26 = smov %s1345_s14  ;;  %s1535_s27 = smov %s1233_s28 }
 0x5a9   : > { %s1536_s28 = smov %s1538_s9  ;;  %19 = sbr.rel (!%p17_p5) target bundleno = 4 (0x4), region = 83 }
 0x5b0   :  { %943 = vsyncpa [#allocation3], 1 }
 0x5b1   :  { %945 = vsyncpa [#allocation3 + $0x1], 1 }

</bundles_post_ra>
